<compile_context>
chip_gen: v7x
topology: tpu7x:2x2x1
jax: 0.10.0
libtpu: 0.0.40
codegen_flags: <defaults>
</compile_context>

<pallas_src>
import functools

import jax
import jax.numpy as jnp
from jax.experimental import pallas as pl
from jax.experimental.pallas import tpu as pltpu


def _round_up(n: int, m: int) -> int:
    return ((n + m - 1) // m) * m


def _vmem_budget_bytes() -> int:
    """~80% of physical VMEM (leave headroom for compiler internal scratch)."""
    try:
        cap = int(pltpu.get_tpu_info().vmem_capacity_bytes)
    except Exception:
        cap = 64 * 1024 * 1024  # conservative (v7x-sized) fallback
    return int(cap * 0.8)


def _gelu_f32(h, approximate: bool):
    if approximate:
        # tanh form: hits the EUP slot, co-issues with MXU work.
        c = jnp.float32(0.7978845608028654)  # sqrt(2/pi)
        return 0.5 * h * (1.0 + jnp.tanh(c * (h + 0.044715 * h * h * h)))
    # Exact erf formulation == torch nn.GELU() default.
    return 0.5 * h * (1.0 + jax.lax.erf(h * jnp.float32(0.7071067811865476)))


def _mlp_kernel_out_acc(x_ref, w1_ref, w2_ref, o_ref, *, gelu_approx):
    """f32 output: accumulate partial fc2 results directly into o_ref across k."""
    k = pl.program_id(1)

    # fc_1 partial: (tm, Dp) @ (Dp, th) -> (tm, th), f32 accumulation on the MXU.
    h = jnp.dot(x_ref[...], w1_ref[...], preferred_element_type=jnp.float32)
    h = _gelu_f32(h, gelu_approx)
    # drop_1: identity (eval mode).

    # fc_2 partial for this hidden tile.
    contrib = jnp.dot(
        h.astype(w2_ref.dtype), w2_ref[...], preferred_element_type=jnp.float32
    )
    # drop_2: identity (eval mode).

    @pl.when(k == 0)
    def _():
        o_ref[...] = contrib

    @pl.when(k > 0)
    def _():
        o_ref[...] += contrib


def _mlp_kernel_scratch(x_ref, w1_ref, w2_ref, o_ref, acc_ref, *, gelu_approx):
    """Non-f32 output: f32 VMEM accumulator, single cast/store at the last k."""
    k = pl.program_id(1)

    @pl.when(k == 0)
    def _():
        acc_ref[...] = jnp.zeros_like(acc_ref)

    h = jnp.dot(x_ref[...], w1_ref[...], preferred_element_type=jnp.float32)
    h = _gelu_f32(h, gelu_approx)
    acc_ref[...] += jnp.dot(
        h.astype(w2_ref.dtype), w2_ref[...], preferred_element_type=jnp.float32
    )

    @pl.when(k == pl.num_programs(1) - 1)
    def _():
        o_ref[...] = acc_ref[...].astype(o_ref.dtype)


@functools.partial(jax.jit, static_argnames=("tm", "th", "gelu_approx"))
def mlp_forward(x, w1_t, w2_t, *, tm=512, th=None, gelu_approx=False):
    """x: (B, S, in_dim); w1_t: (in_dim, hidden); w2_t: (hidden, out_dim).

    th=None -> auto: VMEM-resident weights (single hidden step) when they fit
    the generation's VMEM budget, otherwise a tiled hidden axis.
    """
    B, S, in_dim = x.shape
    hidden = w1_t.shape[1]
    out_dim = w2_t.shape[1]
    M = B * S

    # Lane-dense padded feature dims (multiples of 128).
    Dp = _round_up(in_dim, 128)
    Op = _round_up(out_dim, 128)
    H_full = _round_up(hidden, 128)

    x_item = jnp.dtype(x.dtype).itemsize
    w_item = jnp.dtype(w1_t.dtype).itemsize
    o_item = jnp.dtype(x.dtype).itemsize
    out_is_f32 = jnp.dtype(x.dtype) == jnp.dtype(jnp.float32)

    def working_set(tm_, th_):
        # Double-buffered input/output tiles (+ f32 scratch for non-f32 outputs).
        acc = 0 if out_is_f32 else tm_ * Op * 4
        return (
            2 * (tm_ * Dp * x_item + Dp * th_ * w_item
                 + th_ * Op * w_item + tm_ * Op * o_item)
            + acc
        )

    # ---- Row tile: large (amortizes weight re-stream + per-step overhead),
    # but guarantee >=2 trips on the parallel axis when possible (v7x megacore).
    M_aligned = _round_up(M, 8)
    tm_eff = min(_round_up(max(tm, 8), 8), M_aligned)
    if tm_eff >= M_aligned and M_aligned >= 16:
        tm_eff = _round_up((M_aligned + 1) // 2, 8)

    # ---- Hidden tile: auto-size to the per-generation VMEM budget.
    budget = _vmem_budget_bytes()
    if th is None:
        cands = [H_full] + [
            t for t in (4096, 2048, 1536, 1024, 768, 512, 384, 256, 128)
            if t < H_full
        ]
        th_eff = cands[-1]
        for t in cands:
            if working_set(tm_eff, t) <= budget:
                th_eff = t
                break
    else:
        th_eff = min(_round_up(th, 128), H_full)

    # Last resort: shrink the row tile rather than exceeding the VMEM budget.
    while working_set(tm_eff, th_eff) > budget and tm_eff > 8:
        tm_eff = _round_up(tm_eff // 2, 8)

    Mp = _round_up(M, tm_eff)
    Hp = _round_up(hidden, th_eff)
    num_k = Hp // th_eff
    grid = (Mp // tm_eff, num_k)

    # ---- Padding: skip entirely when already aligned (zero extra HBM traffic
    # for 128-aligned ViT dims; padding with zeros is numerically exact since
    # gelu(0) == 0 and padded weight rows/cols are zero).
    x2d = x.reshape(M, in_dim)
    if Mp != M or Dp != in_dim:
        x2d = jnp.pad(x2d, ((0, Mp - M), (0, Dp - in_dim)))
    w1p = w1_t
    if Dp != in_dim or Hp != hidden:
        w1p = jnp.pad(w1_t, ((0, Dp - in_dim), (0, Hp - hidden)))
    w2p = w2_t
    if Hp != hidden or Op != out_dim:
        w2p = jnp.pad(w2_t, ((0, Hp - hidden), (0, Op - out_dim)))

    # ---- Weight index maps.
    if num_k > 1:
        def _serp(i, k):
            # k when the row tile i is even, num_k-1-k when odd: the still-hot
            # weight tile is reused across row-tile boundaries.
            return k + (i % 2) * (num_k - 1 - 2 * k)
        w1_map = lambda i, k: (0, _serp(i, k))
        w2_map = lambda i, k: (_serp(i, k), 0)
    else:
        # Fully resident weights: constant block index -> DMA'd exactly once.
        w1_map = lambda i, k: (0, 0)
        w2_map = lambda i, k: (0, 0)

    # ---- VMEM limit: enough for the working set (+ headroom), below physical.
    ws = working_set(tm_eff, th_eff)
    vmem_limit = int(min(budget, max(ws + ws // 2, 32 * 1024 * 1024)))
    vmem_limit = max(vmem_limit, ws)

    weight_bytes = (Dp * Hp + Hp * Op) * w_item
    cost = pl.CostEstimate(
        flops=2 * Mp * Dp * Hp + 2 * Mp * Hp * Op,
        transcendentals=Mp * Hp,
        bytes_accessed=(
            Mp * Dp * x_item
            + weight_bytes * (1 if num_k == 1 else Mp // tm_eff)
            + Mp * Op * o_item
        ),
    )

    if out_is_f32:
        kernel = functools.partial(_mlp_kernel_out_acc, gelu_approx=gelu_approx)
        scratch_shapes = []
    else:
        kernel = functools.partial(_mlp_kernel_scratch, gelu_approx=gelu_approx)
        scratch_shapes = [pltpu.VMEM((tm_eff, Op), jnp.float32)]

    out2d = pl.pallas_call(
        kernel,
        out_shape=jax.ShapeDtypeStruct((Mp, Op), x.dtype),
        grid_spec=pltpu.PrefetchScalarGridSpec(
            num_scalar_prefetch=0,
            grid=grid,
            in_specs=[
                pl.BlockSpec((tm_eff, Dp), lambda i, k: (i, 0)),   # x row tile
                pl.BlockSpec((Dp, th_eff), w1_map),                # W1 hidden tile
                pl.BlockSpec((th_eff, Op), w2_map),                # W2 hidden tile
            ],
            out_specs=pl.BlockSpec((tm_eff, Op), lambda i, k: (i, 0)),
            scratch_shapes=scratch_shapes,
        ),
        compiler_params=pltpu.CompilerParams(
            dimension_semantics=("parallel", "arbitrary"),
            vmem_limit_bytes=vmem_limit,
        ),
        cost_estimate=cost,
    )(x2d, w1p, w2p)

    if Mp != M or Op != out_dim:
        out2d = out2d[:M, :out_dim]
    return out2d.reshape(B, S, out_dim)


def _reference(x, w1_t, w2_t):
    h = jnp.einsum("bsd,dh->bsh", x, w1_t)
    h = 0.5 * h * (1.0 + jax.lax.erf(h / jnp.sqrt(2.0)))
    return jnp.einsum("bsh,ho->bso", h, w2_t)


def _make_params(key, in_dim, hidden_dim, out_dim, dtype=jnp.float32):
    k1, k2 = jax.random.split(key)
    # ~nn.Linear init scale: U(-1/sqrt(fan_in), 1/sqrt(fan_in)); stored
    # pre-transposed (fan_in, fan_out) so the kernel does x @ W.
    w1_t = jax.random.uniform(
        k1, (in_dim, hidden_dim), dtype=jnp.float32,
        minval=-1.0 / jnp.sqrt(in_dim), maxval=1.0 / jnp.sqrt(in_dim)).astype(dtype)
    w2_t = jax.random.uniform(
        k2, (hidden_dim, out_dim), dtype=jnp.float32,
        minval=-1.0 / jnp.sqrt(hidden_dim), maxval=1.0 / jnp.sqrt(hidden_dim)).astype(dtype)
    return w1_t, w2_t


if __name__ == "__main__":
    key = jax.random.PRNGKey(0)

    # --- test 1: small config, f32, resident weights (single hidden step) ---
    batch, seq = 2, 8
    in_dim, hidden_dim, out_dim = 32, 64, 32
    kx, kp = jax.random.split(key)
    x = jax.random.normal(kx, (batch, seq, in_dim), dtype=jnp.float32)
    w1_t, w2_t = _make_params(kp, in_dim, hidden_dim, out_dim)

    out = jax.block_until_ready(mlp_forward(x, w1_t, w2_t))
    ref = _reference(x, w1_t, w2_t)
    assert out.shape == (batch, seq, out_dim), out.shape
    assert jnp.allclose(out, ref, atol=1e-5, rtol=1e-5), float(jnp.abs(out - ref).max())

    # --- test 2: ragged M, non-128 dims, multi-step hidden grid (serpentine +
    # output-resident f32 accumulation) ---
    batch2, seq2 = 1, 9
    in2, hid2, od2 = 48, 160, 40
    kx2, kp2 = jax.random.split(kp)
    x2 = jax.random.normal(kx2, (batch2, seq2, in2), dtype=jnp.float32)
    w1b, w2b = _make_params(kp2, in2, hid2, od2)

    out2 = jax.block_until_ready(mlp_forward(x2, w1b, w2b, th=128))  # 2 hidden tiles
    ref2 = _reference(x2, w1b, w2b)
    assert out2.shape == (batch2, seq2, od2), out2.shape
    assert jnp.allclose(out2, ref2, atol=1e-4, rtol=1e-4), float(jnp.abs(out2 - ref2).max())

    # --- test 3: bf16 activations/params (scratch-accumulator path, bf16 MXU) ---
    batch3, seq3 = 1, 16
    in3, hid3, od3 = 128, 256, 128
    kx3, kp3 = jax.random.split(kp2)
    x3 = jax.random.normal(kx3, (batch3, seq3, in3), dtype=jnp.float32)
    w1c, w2c = _make_params(kp3, in3, hid3, od3)
    out3 = jax.block_until_ready(
        mlp_forward(x3.astype(jnp.bfloat16),
                    w1c.astype(jnp.bfloat16), w2c.astype(jnp.bfloat16)))
    ref3 = _reference(x3, w1c, w2c)
    assert out3.shape == (batch3, seq3, od3), out3.shape
    assert jnp.allclose(out3.astype(jnp.float32), ref3, atol=5e-2, rtol=5e-2), (
        float(jnp.abs(out3.astype(jnp.float32) - ref3).max()))

    print("KERNEL_OK")
</pallas_src>

<mosaic_0001>
module attributes {stable_mosaic.version = 11 : i64} {
  func.func @_mlp_kernel_out_acc(%arg0: i32, %arg1: i32, %arg2: memref<8x128xf32, #tpu.memory_space<vmem>>, %arg3: memref<128x128xf32, #tpu.memory_space<vmem>>, %arg4: memref<128x128xf32, #tpu.memory_space<vmem>>, %arg5: memref<8x128xf32, #tpu.memory_space<vmem>>) attributes {dimension_semantics = [#tpu.dimension_semantics<parallel>, #tpu.dimension_semantics<arbitrary>], iteration_bounds = array<i64: 2, 1>, scalar_prefetch = 0 : i64, scratch_operands = 0 : i64, tpu.core_type = #tpu.core_type<tc>, window_params = [{transform_indices = @transform_0, window_bounds = array<i64: 8, 128>}, {pipeline_mode = #tpu.pipeline_mode<synchronous>, transform_indices = @transform_1, window_bounds = array<i64: 128, 128>}, {pipeline_mode = #tpu.pipeline_mode<synchronous>, transform_indices = @transform_2, window_bounds = array<i64: 128, 128>}, {transform_indices = @transform_3, window_bounds = array<i64: 8, 128>}]} {
    %c0 = arith.constant 0 : index
    %c0_0 = arith.constant 0 : index
    %0 = vector.load %arg2[%c0, %c0_0] : memref<8x128xf32, #tpu.memory_space<vmem>>, vector<8x128xf32>
    %c0_1 = arith.constant 0 : index
    %c0_2 = arith.constant 0 : index
    %1 = vector.load %arg3[%c0_1, %c0_2] : memref<128x128xf32, #tpu.memory_space<vmem>>, vector<128x128xf32>
    %cst = arith.constant dense<0.000000e+00> : vector<8x128xf32>
    %2 = tpu.matmul %0, %1, %cst {dimension_numbers = #tpu.dot_dimension_numbers<[1], [0], [0], [1], [0, 0, 1, 1], [], []>} : vector<8x128xf32>, vector<128x128xf32>, vector<8x128xf32> -> vector<8x128xf32>
    %cst_3 = arith.constant 5.000000e-01 : f32
    %3 = vector.broadcast %cst_3 : f32 to vector<8x128xf32>
    %4 = arith.mulf %3, %2 : vector<8x128xf32>
    %cst_4 = arith.constant 0.707106769 : f32
    %5 = vector.broadcast %cst_4 : f32 to vector<8x128xf32>
    %6 = arith.mulf %2, %5 : vector<8x128xf32>
    %7 = math.erf %6 : vector<8x128xf32>
    %cst_5 = arith.constant 1.000000e+00 : f32
    %8 = vector.broadcast %cst_5 : f32 to vector<8x128xf32>
    %9 = arith.addf %8, %7 : vector<8x128xf32>
    %10 = arith.mulf %4, %9 : vector<8x128xf32>
    %c0_6 = arith.constant 0 : index
    %c0_7 = arith.constant 0 : index
    %11 = vector.load %arg4[%c0_6, %c0_7] : memref<128x128xf32, #tpu.memory_space<vmem>>, vector<128x128xf32>
    %cst_8 = arith.constant dense<0.000000e+00> : vector<8x128xf32>
    %12 = tpu.matmul %10, %11, %cst_8 {dimension_numbers = #tpu.dot_dimension_numbers<[1], [0], [0], [1], [0, 0, 1, 1], [], []>} : vector<8x128xf32>, vector<128x128xf32>, vector<8x128xf32> -> vector<8x128xf32>
    %c0_i32 = arith.constant 0 : i32
    %13 = arith.cmpi eq, %arg1, %c0_i32 : i32
    %14 = arith.extui %13 : i1 to i32
    %c0_i32_9 = arith.constant 0 : i32
    %15 = arith.cmpi ne, %14, %c0_i32_9 : i32
    scf.if %15 {
      %c0_12 = arith.constant 0 : index
      %c0_13 = arith.constant 0 : index
      %19 = vector.load %arg5[%c0_12, %c0_13] : memref<8x128xf32, #tpu.memory_space<vmem>>, vector<8x128xf32>
      tpu.vector_store %arg5[%c0_12, %c0_13], %12 {strides = array<i32>} : memref<8x128xf32, #tpu.memory_space<vmem>>, vector<8x128xf32>,
    } else {
    }
    %c0_i32_10 = arith.constant 0 : i32
    %16 = arith.cmpi sgt, %arg1, %c0_i32_10 : i32
    %17 = arith.extui %16 : i1 to i32
    %c0_i32_11 = arith.constant 0 : i32
    %18 = arith.cmpi ne, %17, %c0_i32_11 : i32
    scf.if %18 {
      %c0_12 = arith.constant 0 : index
      %c0_13 = arith.constant 0 : index
      %19 = vector.load %arg5[%c0_12, %c0_13] : memref<8x128xf32, #tpu.memory_space<vmem>>, vector<8x128xf32>
      %20 = arith.addf %19, %12 : vector<8x128xf32>
      %c0_14 = arith.constant 0 : index
      %c0_15 = arith.constant 0 : index
      %21 = vector.load %arg5[%c0_14, %c0_15] : memref<8x128xf32, #tpu.memory_space<vmem>>, vector<8x128xf32>
      tpu.vector_store %arg5[%c0_14, %c0_15], %20 {strides = array<i32>} : memref<8x128xf32, #tpu.memory_space<vmem>>, vector<8x128xf32>,
    } else {
    }
    return
  }
  func.func @transform_0(%arg0: i32, %arg1: i32) -> (i32, i32) {
    %c0_i32 = arith.constant 0 : i32
    %c0_i32_0 = arith.constant 0 : i32
    return %arg0, %c0_i32 : i32, i32
  }
  func.func @transform_1(%arg0: i32, %arg1: i32) -> (i32, i32) {
    %c0_i32 = arith.constant 0 : i32
    %c0_i32_0 = arith.constant 0 : i32
    %c0_i32_1 = arith.constant 0 : i32
    return %c0_i32, %c0_i32_0 : i32, i32
  }
  func.func @transform_2(%arg0: i32, %arg1: i32) -> (i32, i32) {
    %c0_i32 = arith.constant 0 : i32
    %c0_i32_0 = arith.constant 0 : i32
    %c0_i32_1 = arith.constant 0 : i32
    return %c0_i32, %c0_i32_0 : i32, i32
  }
  func.func @transform_3(%arg0: i32, %arg1: i32) -> (i32, i32) {
    %c0_i32 = arith.constant 0 : i32
    %c0_i32_0 = arith.constant 0 : i32
    return %arg0, %c0_i32 : i32, i32
  }
}

</mosaic_0001>

<bundles_post_ra>
// kernel: mlp_forward.1
= control target key start
LH: loop header
LB: loop body
LE: loop exit
PB: predicated region body
PF: predicated region fallthrough
CT: control target
= control target key end

     0   :  { %s666_s12 = smov 0   ;;  %s668_s13 = smov 0   ;;  %s822_s0 = inlined_call_operand.vmem [shape: f32[16,128], index: 0, kind: input, shape index: {}]   ;;  %s823_s1 = inlined_call_operand.vmem [shape: f32[128,128], index: 1, kind: input, shape index: {}]   ;;  %s824_s2 = inlined_call_operand.vmem [shape: f32[128,128], index: 2, kind: input, shape index: {}]   ;;  %s825_s3 = inlined_call_operand.vmem [shape: f32[16,128], index: 3, kind: output, shape index: {}]  }
   0x1   :  { %s670_s14 = smov 0  }
   0x2 LB: > { %s25_s15 = sadd.s32 1, %s637_s13  ;;  %p433_p0 = scmp.ge.s32.totalorder %s641_s14, 1  ;;  %s641_s14 = sphi %s670_s14, %s13_s14   ;;  %s637_s13 = sphi %s668_s13, %s827_s13   ;;  %s633_s12 = sphi %s666_s12, %s826_s12  }
   0x3   : > { %p27_p1 = scmp.ge.s32.totalorder %s25_s15, 2  ;;  %p148_p2 = scmp.lt.s32.totalorder %s641_s14, 3 }
   0x5   : > { %s829_s15 = smov (%p27_p1, %s25_s15), 0  ;;  %p149_p3 = pnand %p433_p0, %p148_p2 }
   0x6   : > { %v179_v0 = vld [vmem:[%s823_s1] sm:$0xff] (!%p149_p3)  ;;  %v180_v1 = vld [vmem:[%s823_s1 + $0x8] sm:$0xff] (!%p149_p3)  ;;  %v181_v2 = vld [vmem:[%s823_s1 + $0x10] sm:$0xff] (!%p149_p3)  ;;  %v643_v3 = vmov (!%p149_p3), 0.0|0.0   ;;  %vm644_vm0 = vmmov (!%p149_p3), 0   ;;  %v645_v6 = vmov (!%p149_p3), 0.0  }
   0x7   : > { %152 = sbr.rel (%p149_p3) target bundleno = 482 (0x1e2), region = 32  ;;  %542 = vmatprep.subr.bf16.mxu0 (!%p149_p3), %v643_v3  ;;  %v543_v4 = vpack.c.bf16 (!%p149_p3), %v180_v1, %v179_v0  ;;  %v182_v5 = vld [vmem:[%s823_s1 + $0x18] sm:$0xff] (!%p149_p3)  ;;  %504 = vmatprep.mubr.msk.f32.mxu0 (!%p149_p3), %vm644_vm0, %v645_v6  ;;  %v183_v8 = vld [vmem:[%s823_s1 + $0x20] sm:$0xff] (!%p149_p3)  ;;  %v184_v9 = vld [vmem:[%s823_s1 + $0x28] sm:$0xff] (!%p149_p3)  ;;  %p170_p4 = scmp.lt.s32.totalorder (!%p149_p3), %s633_s12, 1 }
   0x8   : > { %566 = vmatprep.subr.bf16.mxu1 (!%p149_p3), %v643_v3  ;;  %539 = vmatprep.mubr.msk.f32.mxu1 (!%p149_p3), %vm644_vm0, %v645_v6  ;;  %v546_v7 = vpack.c.bf16 (!%p149_p3), %v182_v5, %v181_v2  ;;  %v270_v10 = vld [vmem:[%s824_s2] sm:$0xff] (!%p149_p3)  ;;  %v271_v11 = vld [vmem:[%s824_s2 + $0x8] sm:$0xff] (!%p149_p3)  ;;  %v272_v13 = vld [vmem:[%s824_s2 + $0x10] sm:$0xff] (!%p149_p3)  ;;  %v549_v15 = vpack.c.bf16 (!%p149_p3), %v184_v9, %v183_v8 }
   0x9   : > { %544 = vmatpush3.bf16.msra.mxu0 (!%p149_p3), %v543_v4  ;;  %v567_v12 = vpack.c.bf16 (!%p149_p3), %v271_v11, %v270_v10  ;;  %v273_v14 = vld [vmem:[%s824_s2 + $0x18] sm:$0xff] (!%p149_p3)  ;;  %v185_v16 = vld [vmem:[%s823_s1 + $0x30] sm:$0xff] (!%p149_p3)  ;;  %v274_v19 = vld [vmem:[%s824_s2 + $0x20] sm:$0xff] (!%p149_p3) }
   0xa   : > { %545 = vmatprep.subr.bf16.mxu0 (!%p149_p3), %v643_v3  ;;  %v186_v17 = vld [vmem:[%s823_s1 + $0x38] sm:$0xff] (!%p149_p3)  ;;  %v570_v18 = vpack.c.bf16 (!%p149_p3), %v273_v14, %v272_v13  ;;  %v275_v20 = vld [vmem:[%s824_s2 + $0x28] sm:$0xff] (!%p149_p3)  ;;  %v187_v22 = vld [vmem:[%s823_s1 + $0x40] sm:$0xff] (!%p149_p3) }
   0xb   : > { %568 = vmatpush3.bf16.msra.mxu1 (!%p149_p3), %v567_v12  ;;  %v552_v21 = vpack.c.bf16 (!%p149_p3), %v186_v17, %v185_v16  ;;  %v188_v23 = vld [vmem:[%s823_s1 + $0x48] sm:$0xff] (!%p149_p3)  ;;  %v573_v24 = vpack.c.bf16 (!%p149_p3), %v275_v20, %v274_v19  ;;  %v276_v25 = vld [vmem:[%s824_s2 + $0x30] sm:$0xff] (!%p149_p3)  ;;  %v277_v26 = vld [vmem:[%s824_s2 + $0x38] sm:$0xff] (!%p149_p3) }
   0xc   : > { %569 = vmatprep.subr.bf16.mxu1 (!%p149_p3), %v643_v3  ;;  %v555_v27 = vpack.c.bf16 (!%p149_p3), %v188_v23, %v187_v22  ;;  %v189_v28 = vld [vmem:[%s823_s1 + $0x50] sm:$0xff] (!%p149_p3)  ;;  %v190_v29 = vld [vmem:[%s823_s1 + $0x58] sm:$0xff] (!%p149_p3)  ;;  %v576_v30 = vpack.c.bf16 (!%p149_p3), %v277_v26, %v276_v25  ;;  %v191_v32 = vld [vmem:[%s823_s1 + $0x60] sm:$0xff] (!%p149_p3) }
   0xd   : > { %547 = vmatpush3.bf16.msra.mxu0 (!%p149_p3), %v546_v7  ;;  %v558_v31 = vpack.c.bf16 (!%p149_p3), %v190_v29, %v189_v28  ;;  %v192_v33 = vld [vmem:[%s823_s1 + $0x68] sm:$0xff] (!%p149_p3)  ;;  %v193_v35 = vld [vmem:[%s823_s1 + $0x70] sm:$0xff] (!%p149_p3)  ;;  %v194_v36 = vld [vmem:[%s823_s1 + $0x78] sm:$0xff] (!%p149_p3) }
   0xe   : > { %548 = vmatprep.subr.bf16.mxu0 %v643_v3  ;;  %s831_s12 = smov (!%p170_p4, %s633_s12), 1  ;;  %v561_v34 = vpack.c.bf16 %v192_v33, %v191_v32  ;;  %v564_v37 = vpack.c.bf16 %v194_v36, %v193_v35  ;;  %v278_v39 = vld [vmem:[%s824_s2 + $0x40] sm:$0xff]  ;;  %v279_v40 = vld [vmem:[%s824_s2 + $0x48] sm:$0xff]  ;;  %v280_v42 = vld [vmem:[%s824_s2 + $0x50] sm:$0xff] }
   0xf   : > { %571 = vmatpush3.bf16.msra.mxu1 %v570_v18  ;;  %s434_s18 = sshll.u32 %s831_s12, 3  ;;  %v579_v41 = vpack.c.bf16 %v279_v40, %v278_v39  ;;  %v281_v43 = vld [vmem:[%s824_s2 + $0x58] sm:$0xff]  ;;  %v282_v45 = vld [vmem:[%s824_s2 + $0x60] sm:$0xff]  ;;  %v283_v46 = vld [vmem:[%s824_s2 + $0x68] sm:$0xff] }
  0x10   : > { %572 = vmatprep.subr.bf16.mxu1 %v643_v3  ;;  %s173_s21 = scalar_lea.vmem %s822_s0, %s434_s18  ;;  %v582_v44 = vpack.c.bf16 %v281_v43, %v280_v42  ;;  %v585_v47 = vpack.c.bf16 %v283_v46, %v282_v45  ;;  %v284_v48 = vld [vmem:[%s824_s2 + $0x70] sm:$0xff]  ;;  %v285_v49 = vld [vmem:[%s824_s2 + $0x78] sm:$0xff]  ;;  %s177_s17 = scalar_lea.vmem %s825_s3, %s434_s18 }
  0x11   : > { %550 = vmatpush3.bf16.msra.mxu0 %v549_v15  ;;  %v178_v38 = vld [vmem:[%s173_s21] sm:$0xff]  ;;  %v588_v50 = vpack.c.bf16 %v285_v49, %v284_v48 }
  0x12   : > { %551 = vmatprep.subr.bf16.mxu0 %v643_v3 }
  0x13   : > { %574 = vmatpush3.bf16.msra.mxu1 %v573_v24 }
  0x14   : > { %575 = vmatprep.subr.bf16.mxu1 %v643_v3 }
  0x15   : > { %553 = vmatpush3.bf16.msra.mxu0 %v552_v21 }
  0x16   : > { %554 = vmatprep.subr.bf16.mxu0 %v643_v3 }
  0x17   : > { %577 = vmatpush3.bf16.msra.mxu1 %v576_v30 }
  0x18   : > { %578 = vmatprep.subr.bf16.mxu1 %v643_v3 }
  0x19   : > { %556 = vmatpush3.bf16.msra.mxu0 %v555_v27 }
  0x1a   : > { %557 = vmatprep.subr.bf16.mxu0 %v643_v3 }
  0x1b   : > { %580 = vmatpush3.bf16.msra.mxu1 %v579_v41 }
  0x1c   : > { %581 = vmatprep.subr.bf16.mxu1 %v643_v3 }
  0x1d   : > { %559 = vmatpush3.bf16.msra.mxu0 %v558_v31 }
  0x1e   : > { %560 = vmatprep.subr.bf16.mxu0 %v643_v3 }
  0x1f   : > { %583 = vmatpush3.bf16.msra.mxu1 %v582_v44 }
  0x20   : > { %584 = vmatprep.subr.bf16.mxu1 %v643_v3 }
  0x21   : > { %562 = vmatpush3.bf16.msra.mxu0 %v561_v34 }
  0x22   : > { %563 = vmatprep.subr.bf16.mxu0 %v643_v3 }
  0x23   : > { %586 = vmatpush3.bf16.msra.mxu1 %v585_v47 }
  0x24   : > { %587 = vmatprep.subr.bf16.mxu1 %v643_v3 }
  0x25   : > { %565 = vmatpush3.bf16.msra.mxu0 %v564_v37 }
  0x27   : > { %589 = vmatpush3.bf16.msra.mxu1 %v588_v50 }
  0x28   : > { %505 = vmatmul.mubr.f32.vlgmr.msra.gmra.mrb[0].mxu0 %v178_v38 }
  0xfb   : > { %v261_v51 = vpop.f32.mrb[0].mxu0 }
  0xfc   : > { %v266_v52 = vmul.f32 0.70710677, %v261_v51  ;;  %v506_v53 = vpop.f32.mrb[1].mxu0  ;;  %v265_v55 = vmul.f32 0.5, %v261_v51 }
  0xfe   : > { %617 = verf.f32 %v266_v52 }
 0x108   : > { %v618_v54 = vpop.eup %617 }
 0x109   : > { %v268_v56 = vadd.f32 1.0, %v618_v54 }
 0x10b   : > { %v269_v57 = vmul.f32 %v268_v56, %v265_v55 }
 0x10d   : > { %540 = vmatmul.mubr.f32.vlgmr.msra.gmra.mrb[0].mxu1 %v269_v57 }
 0x1e0   : > { %v352_v58 = vpop.f32.mrb[0].mxu1 }
 0x1e1   : > { %360 = vst [vmem:[%s177_s17] sm:$0xff] %v352_v58  ;;  %v541_v59 = vpop.f32.mrb[1].mxu1 }
 0x1e2 PF: > { %s13_s14 = sadd.s32 1, %s641_s14   ;;  %s826_s12 = smov %s637_s13 }
 0x1e3   : > { %p10_p5 = scmp.ge.s32.totalorder %s13_s14, 4   ;;  %s827_s13 = smov %s829_s15 }
 0x1e5   :  { %12 = sbr.rel (!%p10_p5) target bundleno = 2 (0x2), region = 70 }

</bundles_post_ra>
